<compile_context>
chip_gen: v7x
topology: tpu7x:2x2x1
jax: 0.10.0
libtpu: 0.0.40
codegen_flags: <defaults>
</compile_context>

<pallas_src>
import jax
import jax.numpy as jnp
from jax.experimental import pallas as pl
from jax.experimental.pallas import tpu as pltpu

LANES = 128
SUBLANES = 8
MAX_TILE_ROWS = 2048   # rows per grid step: 2048*128*4B = 1 MiB per f32 block


def _dice_partial_kernel(p_ref, l_ref, acc_ref):
    """Accumulate (sum(p*l), sum(p), sum(l)) as (8,128)-shaped vector partials."""
    # acc_ref block: (1, 3, SUBLANES, LANES); resident across the inner axis.
    @pl.when(pl.program_id(1) == 0)
    def _():
        acc_ref[...] = jnp.zeros_like(acc_ref)

    p = p_ref[...].astype(jnp.float32)
    l = l_ref[...].astype(jnp.float32)

    # Fold the (tile_rows, 128) tile into vreg-shaped (8, 128) partials with
    # pure cross-vreg VPU adds (reduction over the leading axis only; the
    # reshape splits rows in groups of 8, i.e. it respects (8,128) tiles).
    pv = p.reshape(-1, SUBLANES, LANES)
    lv = l.reshape(-1, SUBLANES, LANES)
    acc_ref[0, 0] += jnp.sum(pv * lv, axis=0)
    acc_ref[0, 1] += jnp.sum(pv, axis=0)
    acc_ref[0, 2] += jnp.sum(lv, axis=0)


def dice_loss(predicts, labels, smooth=1.0):
    """Pallas TPU implementation of DiceLoss.forward. Returns an f32 scalar."""
    assert predicts.shape == labels.shape
    total = predicts.size
    smooth = jnp.float32(smooth)

    # Flatten in native dtype (bitcast-free reshape; the f32 cast happens
    # inside the kernel so HBM traffic stays at the native element width).
    p_flat = predicts.reshape(-1)
    l_flat = labels.reshape(-1)

    inter = jnp.float32(0.0)
    psum = jnp.float32(0.0)
    lsum = jnp.float32(0.0)

    rows = total // LANES          # number of full 128-lane rows
    main_elems = 0

    if rows >= SUBLANES:
        # Split the row range across (up to) 2 TensorCores, then tile each
        # core's range into large, sublane-aligned row blocks.
        ncores = 2 if rows >= 2 * SUBLANES else 1
        rows_per_core = rows // ncores
        num_tiles_pc = max(1, -(-rows_per_core // MAX_TILE_ROWS))
        tile_rows = max(SUBLANES,
                        (rows_per_core // num_tiles_pc) // SUBLANES * SUBLANES)
        num_tiles_pc = rows_per_core // tile_rows
        rows_main = ncores * num_tiles_pc * tile_rows
        main_elems = rows_main * LANES

        if total == rows * LANES:
            # Zero-copy: contiguous flat array reshapes for free.
            p2d = p_flat.reshape(rows, LANES)
            l2d = l_flat.reshape(rows, LANES)
        else:
            # Ragged total: one prefix slice to form the slab; the sub-row
            # tail (< 128 elements) is summed with plain jnp below.
            p2d = p_flat[: rows * LANES].reshape(rows, LANES)
            l2d = l_flat[: rows * LANES].reshape(rows, LANES)

        def row_block_map(c, i):
            return (c * num_tiles_pc + i, 0)

        partials = pl.pallas_call(
            _dice_partial_kernel,
            out_shape=jax.ShapeDtypeStruct((ncores, 3, SUBLANES, LANES),
                                           jnp.float32),
            grid_spec=pltpu.PrefetchScalarGridSpec(
                num_scalar_prefetch=0,
                grid=(ncores, num_tiles_pc),
                in_specs=[
                    pl.BlockSpec((tile_rows, LANES), row_block_map),
                    pl.BlockSpec((tile_rows, LANES), row_block_map),
                ],
                out_specs=pl.BlockSpec((1, 3, SUBLANES, LANES),
                                       lambda c, i: (c, 0, 0, 0)),
            ),
            compiler_params=pltpu.CompilerParams(
                dimension_semantics=("parallel", "arbitrary")),
        )(p2d, l2d)

        # Single (tiny) cross-lane reduction + per-core combine, done in XLA.
        inter = inter + jnp.sum(partials[:, 0])
        psum = psum + jnp.sum(partials[:, 1])
        lsum = lsum + jnp.sum(partials[:, 2])

    if main_elems < total:
        # Ragged tail and/or input too small to form a single (8,128) tile:
        # a bounded, small fraction of the data, summed with plain jnp.
        pt = p_flat[main_elems:].astype(jnp.float32)
        lt = l_flat[main_elems:].astype(jnp.float32)
        inter = inter + jnp.sum(pt * lt)
        psum = psum + jnp.sum(pt)
        lsum = lsum + jnp.sum(lt)

    return (2.0 * inter + smooth) / (psum + lsum + smooth)


def _dice_ref(predicts, labels, smooth=1.0):
    p = predicts.reshape(predicts.shape[0], -1).astype(jnp.float32)
    l = labels.reshape(labels.shape[0], -1).astype(jnp.float32)
    inter = jnp.sum(p * l)
    return (2.0 * inter + smooth) / (jnp.sum(p) + jnp.sum(l) + smooth)


if __name__ == "__main__":
    key = jax.random.PRNGKey(0)
    k1, k2 = jax.random.split(key)

    # NCHW-shaped inputs, as a segmentation head would produce.
    predicts = jax.nn.sigmoid(jax.random.normal(k1, (2, 4, 16, 16), jnp.float32))
    labels = (jax.random.uniform(k2, (2, 4, 16, 16)) > 0.5).astype(jnp.float32)

    score = jax.block_until_ready(dice_loss(predicts, labels, smooth=1.0))
    ref = _dice_ref(predicts, labels, smooth=1.0)

    assert jnp.allclose(score, ref, rtol=1e-5, atol=1e-6), (score, ref)
    print("KERNEL_OK")
</pallas_src>

<mosaic_0001>
module attributes {stable_mosaic.version = 11 : i64} {
  func.func @_dice_partial_kernel(%arg0: i32, %arg1: i32, %arg2: memref<8x128xf32, #tpu.memory_space<vmem>>, %arg3: memref<8x128xf32, #tpu.memory_space<vmem>>, %arg4: memref<1x3x8x128xf32, #tpu.memory_space<vmem>>) attributes {dimension_semantics = [#tpu.dimension_semantics<parallel>, #tpu.dimension_semantics<arbitrary>], iteration_bounds = array<i64: 2, 1>, scalar_prefetch = 0 : i64, scratch_operands = 0 : i64, tpu.core_type = #tpu.core_type<tc>, window_params = [{transform_indices = @transform_0, window_bounds = array<i64: 8, 128>}, {transform_indices = @transform_1, window_bounds = array<i64: 8, 128>}, {transform_indices = @transform_2, window_bounds = array<i64: 1, 3, 8, 128>}]} {
    %c0_i32 = arith.constant 0 : i32
    %0 = arith.cmpi eq, %arg1, %c0_i32 : i32
    %1 = arith.extui %0 : i1 to i32
    %c0_i32_0 = arith.constant 0 : i32
    %2 = arith.cmpi ne, %1, %c0_i32_0 : i32
    scf.if %2 {
      %cst_28 = arith.constant 0.000000e+00 : f32
      %29 = vector.broadcast %cst_28 : f32 to vector<1x3x8x128xf32>
      %c0_29 = arith.constant 0 : index
      %c0_30 = arith.constant 0 : index
      %c0_31 = arith.constant 0 : index
      %c0_32 = arith.constant 0 : index
      %30 = vector.load %arg4[%c0_29, %c0_30, %c0_31, %c0_32] : memref<1x3x8x128xf32, #tpu.memory_space<vmem>>, vector<1x3x8x128xf32>
      tpu.vector_store %arg4[%c0_29, %c0_30, %c0_31, %c0_32], %29 {strides = array<i32>} : memref<1x3x8x128xf32, #tpu.memory_space<vmem>>, vector<1x3x8x128xf32>,
    } else {
    }
    %c0 = arith.constant 0 : index
    %c0_1 = arith.constant 0 : index
    %3 = vector.load %arg2[%c0, %c0_1] : memref<8x128xf32, #tpu.memory_space<vmem>>, vector<8x128xf32>
    %c0_2 = arith.constant 0 : index
    %c0_3 = arith.constant 0 : index
    %4 = vector.load %arg3[%c0_2, %c0_3] : memref<8x128xf32, #tpu.memory_space<vmem>>, vector<8x128xf32>
    %5 = vector.shape_cast %3 : vector<8x128xf32> to vector<1x8x128xf32>
    %6 = vector.shape_cast %4 : vector<8x128xf32> to vector<1x8x128xf32>
    %c0_4 = arith.constant 0 : index
    %c0_5 = arith.constant 0 : index
    %c0_6 = arith.constant 0 : index
    %c0_7 = arith.constant 0 : index
    %7 = vector.load %arg4[%c0_4, %c0_5, %c0_6, %c0_7] : memref<1x3x8x128xf32, #tpu.memory_space<vmem>>, vector<1x1x8x128xf32>
    %8 = vector.shape_cast %7 : vector<1x1x8x128xf32> to vector<8x128xf32>
    %9 = arith.mulf %5, %6 : vector<1x8x128xf32>
    %cst = arith.constant dense<0.000000e+00> : vector<8x128xf32>
    %10 = vector.multi_reduction <add>, %9, %cst [0] : vector<1x8x128xf32> to vector<8x128xf32>
    %11 = arith.addf %8, %10 : vector<8x128xf32>
    %c0_8 = arith.constant 0 : index
    %c0_9 = arith.constant 0 : index
    %c0_10 = arith.constant 0 : index
    %c0_11 = arith.constant 0 : index
    %12 = vector.load %arg4[%c0_8, %c0_9, %c0_10, %c0_11] : memref<1x3x8x128xf32, #tpu.memory_space<vmem>>, vector<1x1x8x128xf32>
    %13 = vector.shape_cast %12 : vector<1x1x8x128xf32> to vector<8x128xf32>
    %14 = vector.shape_cast %11 : vector<8x128xf32> to vector<1x1x8x128xf32>
    tpu.vector_store %arg4[%c0_8, %c0_9, %c0_10, %c0_11], %14 {strides = array<i32>} : memref<1x3x8x128xf32, #tpu.memory_space<vmem>>, vector<1x1x8x128xf32>,
    %c0_12 = arith.constant 0 : index
    %c1 = arith.constant 1 : index
    %c0_13 = arith.constant 0 : index
    %c0_14 = arith.constant 0 : index
    %15 = vector.load %arg4[%c0_12, %c1, %c0_13, %c0_14] : memref<1x3x8x128xf32, #tpu.memory_space<vmem>>, vector<1x1x8x128xf32>
    %16 = vector.shape_cast %15 : vector<1x1x8x128xf32> to vector<8x128xf32>
    %cst_15 = arith.constant dense<0.000000e+00> : vector<8x128xf32>
    %17 = vector.multi_reduction <add>, %5, %cst_15 [0] : vector<1x8x128xf32> to vector<8x128xf32>
    %18 = arith.addf %16, %17 : vector<8x128xf32>
    %c0_16 = arith.constant 0 : index
    %c1_17 = arith.constant 1 : index
    %c0_18 = arith.constant 0 : index
    %c0_19 = arith.constant 0 : index
    %19 = vector.load %arg4[%c0_16, %c1_17, %c0_18, %c0_19] : memref<1x3x8x128xf32, #tpu.memory_space<vmem>>, vector<1x1x8x128xf32>
    %20 = vector.shape_cast %19 : vector<1x1x8x128xf32> to vector<8x128xf32>
    %21 = vector.shape_cast %18 : vector<8x128xf32> to vector<1x1x8x128xf32>
    tpu.vector_store %arg4[%c0_16, %c1_17, %c0_18, %c0_19], %21 {strides = array<i32>} : memref<1x3x8x128xf32, #tpu.memory_space<vmem>>, vector<1x1x8x128xf32>,
    %c0_20 = arith.constant 0 : index
    %c2 = arith.constant 2 : index
    %c0_21 = arith.constant 0 : index
    %c0_22 = arith.constant 0 : index
    %22 = vector.load %arg4[%c0_20, %c2, %c0_21, %c0_22] : memref<1x3x8x128xf32, #tpu.memory_space<vmem>>, vector<1x1x8x128xf32>
    %23 = vector.shape_cast %22 : vector<1x1x8x128xf32> to vector<8x128xf32>
    %cst_23 = arith.constant dense<0.000000e+00> : vector<8x128xf32>
    %24 = vector.multi_reduction <add>, %6, %cst_23 [0] : vector<1x8x128xf32> to vector<8x128xf32>
    %25 = arith.addf %23, %24 : vector<8x128xf32>
    %c0_24 = arith.constant 0 : index
    %c2_25 = arith.constant 2 : index
    %c0_26 = arith.constant 0 : index
    %c0_27 = arith.constant 0 : index
    %26 = vector.load %arg4[%c0_24, %c2_25, %c0_26, %c0_27] : memref<1x3x8x128xf32, #tpu.memory_space<vmem>>, vector<1x1x8x128xf32>
    %27 = vector.shape_cast %26 : vector<1x1x8x128xf32> to vector<8x128xf32>
    %28 = vector.shape_cast %25 : vector<8x128xf32> to vector<1x1x8x128xf32>
    tpu.vector_store %arg4[%c0_24, %c2_25, %c0_26, %c0_27], %28 {strides = array<i32>} : memref<1x3x8x128xf32, #tpu.memory_space<vmem>>, vector<1x1x8x128xf32>,
    return
  }
  func.func @transform_0(%arg0: i32, %arg1: i32) -> (i32, i32) {
    %c1_i32 = arith.constant 1 : i32
    %0 = arith.muli %arg0, %c1_i32 : i32
    %1 = arith.addi %0, %arg1 : i32
    %c0_i32 = arith.constant 0 : i32
    %c0_i32_0 = arith.constant 0 : i32
    return %1, %c0_i32 : i32, i32
  }
  func.func @transform_1(%arg0: i32, %arg1: i32) -> (i32, i32) {
    %c1_i32 = arith.constant 1 : i32
    %0 = arith.muli %arg0, %c1_i32 : i32
    %1 = arith.addi %0, %arg1 : i32
    %c0_i32 = arith.constant 0 : i32
    %c0_i32_0 = arith.constant 0 : i32
    return %1, %c0_i32 : i32, i32
  }
  func.func @transform_2(%arg0: i32, %arg1: i32) -> (i32, i32, i32, i32) {
    %c0_i32 = arith.constant 0 : i32
    %c0_i32_0 = arith.constant 0 : i32
    %c0_i32_1 = arith.constant 0 : i32
    %c0_i32_2 = arith.constant 0 : i32
    return %arg0, %c0_i32, %c0_i32_0, %c0_i32_1 : i32, i32, i32, i32
  }
}

</mosaic_0001>

<bundles_post_ra>
// kernel: tpu_custom_call.1
= control target key start
LH: loop header
LB: loop body
LE: loop exit
PB: predicated region body
PF: predicated region fallthrough
CT: control target
= control target key end

     0   :  { %7 = vsyncpa [#allocation3], 0  ;;  %s841_s0 = inlined_call_operand.hbm [shape: f32[16,128], index: 0, kind: input, shape index: {}]   ;;  %s842_s1 = inlined_call_operand.hbm [shape: f32[16,128], index: 1, kind: input, shape index: {}]   ;;  %s843_s2 = inlined_call_operand.hbm [shape: f32[2,3,8,128], index: 2, kind: output, shape index: {}]  }
   0x1   :  { %9 = vsyncpa [#allocation3 + $0x1], 0 }
   0x2   :  { %10 = vsyncpa [#allocation6], 0 }
   0x3   :  { %12 = vsyncpa [#allocation6 + $0x1], 0 }
   0x4   :  { %13 = vsyncpa [#allocation4], 0 }
   0x5   :  { %15 = vsyncpa [#allocation4 + $0x1], 0  ;;  %s618_s9 = smov 0   ;;  %s620_s10 = smov 0  }
   0x6   :  { %s622_s11 = smov 0   ;;  %s624_s12 = smov 0  }
   0x7   :  { %s626_s13 = smov 0   ;;  %s628_s14 = smov 0  }
   0x8 LB: > { %s360_s15 = sadd.s32 4294967295, %s596_s14   ;;  %s361_s16 = sadd.s32 4294967294, %s596_s14   ;;  %s596_s14 = sphi %s628_s14, %s21_s14   ;;  %s592_s13 = sphi %s626_s13, %s863_s13   ;;  %s588_s12 = sphi %s624_s12, %s862_s12   ;;  %s584_s11 = sphi %s622_s11, %s861_s11   ;;  %s580_s10 = sphi %s620_s10, %s860_s10   ;;  %s576_s9 = sphi %s618_s9, %s859_s9  }
   0x9   : > { %s33_s17 = sadd.s32 1, %s592_s13  ;;  %s42_s18 = sadd.s32 1, %s584_s11 }
   0xa   : > { %p35_p0 = scmp.ge.s32.totalorder %s33_s17, 2  ;;  %p49_p1 = scmp.ne.s32.totalorder %s584_s11, %s580_s10 }
   0xb   : > { %p50_p2 = scmp.eq.s32.totalorder %s596_s14, 0  ;;  %p55_p3 = scmp.ne.s32.totalorder %s580_s10, %s576_s9 }
   0xc   : > { %s865_s17 = smov (%p35_p0, %s33_s17), 0  ;;  %p56_p5 = scmp.eq.s32.totalorder %s360_s15, 0 }
   0xd   : > { %p659_p4 = por %p50_p2, %p49_p1  ;;  %s39_s20 = ssub.s32 %s592_s13, %s865_s17 }
   0xe   : > { %p107_p6 = scmp.eq.s32.totalorder %s360_s15, 1  ;;  %p40_p7 = scmp.eq.s32.totalorder %s39_s20, 0 }
   0xf   : > { %p665_p8 = por %p56_p5, %p55_p3  ;;  %p113_p10 = scmp.eq.s32.totalorder %s361_s16, 1 }
  0x10   : > { %p669_p9 = por %p107_p6, %p49_p1  ;;  %p397_p13 = scmp.lt.s32.totalorder %s596_s14, 2 }
  0x11   : > { %s847_s21 = scalar_select %p665_p8, 1, 0 }
  0x12   : > { %s848_s22 = scalar_select %p669_p9, 1, 0 }
  0x13   : > { %s674_s23 = scalar_select %p40_p7, %s584_s11, %s42_s18  }
  0x14   : > { %p676_p11 = por %p113_p10, %p55_p3  ;;  %s683_s25 = sand.u32 1, %s584_s11  }
  0x15   : > { %s364_s26 = sshll.u32 %s683_s25, 3  ;;  %s365_s27 = sshll.u32 %s592_s13, 7 }
  0x16   : > { %s849_s24 = scalar_select %p676_p11, 1, 0 }
  0x17   : > { %s692_s30 = scalar_lea.hbm %s841_s0, %s365_s27  ;;  %s137_s3 = scalar_lea.vmem [#allocation2], %s364_s26 }
  0x18   : > { %s145_s4 = sshll.u32 %s137_s3, 4  ;;  %p700_p0 = pnand %p397_p13, %p659_p4  ;;  %s696_s4 = int_to_ptr.vmem [resolvable:$true] %s145_s4 }
  0x19   : > { %s134_s6 = scalar_lea.sflag [#allocation3], %s683_s25  ;;  %s450_s7 = scalar_lea.hbm %s692_s30, 128 }
  0x1a   : > { %p451_p3 = scmp.ne.s32.totalorder %s692_s30, %s450_s7  ;;  %p452_p5 = pneg %p700_p0 }
  0x1b   : > { %s455_s16 = scalar_lea.hbm %s841_s0, 256  ;;  %p456_p4 = scmp.lt.u32.totalorder %s692_s30, %s841_s0 }
  0x1c   : > { %p453_p6 = pnand %p452_p5, %p451_p3  ;;  %p457_p10 = scmp.lt.u32.totalorder %s455_s16, %s450_s7 }
  0x1d   : > { %p459_p12 = scmp.lt.u32.totalorder %s450_s7, %s692_s30 }
  0x1e   : > { %p454_p7 = pneg %p453_p6  ;;  %p458_p13 = por %p457_p10, %p456_p4 }
  0x20   : > { %p460_p1 = por %p459_p12, %p458_p13 }
  0x22   : > { %p461_p2 = pnand %p460_p1, %p454_p7 }
  0x24   : > { %464 = shalt.err (!%p461_p2)
}
  0x25   : > { %s465_s20 = scalar_lea.vmem %s696_s4, 128  ;;  %s598_s28 = smov [#allocation2]  }
  0x26   : > { %p466_p3 = scmp.ne.s32.totalorder %s696_s4, %s465_s20  ;;  %s470_s29 = sshll.u32 %s598_s28, 4  ;;  %s471_s29 = int_to_ptr.vmem [resolvable:$false] %s470_s29 }
  0x27   : > { %s472_s3 = scalar_lea.vmem %s471_s29, 256  ;;  %p473_p9 = scmp.lt.s32.totalorder %s696_s4, %s471_s29 }
  0x28   : > { %p468_p6 = pnand %p466_p3, %p452_p5  ;;  %p474_p4 = scmp.lt.s32.totalorder %s472_s3, %s465_s20 }
  0x2a   : > { %p469_p11 = pneg %p468_p6  ;;  %p475_p10 = por %p474_p4, %p473_p9 }
  0x2c   : > { %p476_p12 = pnand %p475_p10, %p469_p11 }
  0x2e   : > { %479 = shalt.err (!%p476_p12)
}
  0x2f   : > { %389 = dma.hbm_to_vmem [thread:$0]  (!%p700_p0), %s692_s30, 128, %s696_s4, %s134_s6  }
  0x30   : > { %p851_p1 = scmp.lt.s32.totalorder %s596_s14, 3  ;;  %p852_p2 = scmp.ge.s32.totalorder %s596_s14, 1 }
  0x31   : > { %s745_s16 = scalar_lea.hbm %s842_s1, %s365_s27  ;;  %s156_s18 = scalar_lea.vmem [#allocation5], %s364_s26 }
  0x32   : > { %p736_p7 = pnand %p852_p2, %p851_p1  ;;  %s164_s19 = sshll.u32 %s156_s18, 4  ;;  %s165_s19 = int_to_ptr.vmem [resolvable:$true] %s164_s19 }
  0x33   : > { %s153_s30 = scalar_lea.sflag [#allocation6], %s683_s25  ;;  %s480_s4 = scalar_lea.hbm %s745_s16, 128 }
  0x34   : > { %s853_s7 = scalar_select %p736_p7, 1, 0 }
  0x35   : > { %p481_p9 = scmp.ne.s32.totalorder %s745_s16, %s480_s4  ;;  %s485_s27 = scalar_lea.hbm %s842_s1, 256 }
  0x36   : > { %p486_p3 = scmp.lt.u32.totalorder %s745_s16, %s842_s1  ;;  %p487_p6 = scmp.lt.u32.totalorder %s485_s27, %s480_s4 }
  0x37   : > { %p483_p11 = pnand %p481_p9, %p452_p5  ;;  %p489_p10 = scmp.lt.u32.totalorder %s480_s4, %s745_s16 }
  0x38   : > { %p488_p4 = por %p487_p6, %p486_p3 }
  0x39   : > { %p484_p13 = pneg %p483_p11 }
  0x3a   : > { %p490_p12 = por %p489_p10, %p488_p4 }
  0x3c   : > { %p491_p1 = pnand %p490_p12, %p484_p13 }
  0x3e   : > { %494 = shalt.err (!%p491_p1)
}
  0x3f   : > { %s495_s25 = scalar_lea.vmem %s165_s19, 128  ;;  %s599_s26 = smov [#allocation5]  }
  0x40   : > { %p496_p2 = scmp.ne.s32.totalorder %s165_s19, %s495_s25  ;;  %s500_s3 = sshll.u32 %s599_s26, 4  ;;  %s501_s3 = int_to_ptr.vmem [resolvable:$false] %s500_s3 }
  0x41   : > { %s502_s8 = scalar_lea.vmem %s501_s3, 256  ;;  %p503_p8 = scmp.lt.s32.totalorder %s165_s19, %s501_s3 }
  0x42   : > { %p498_p9 = pnand %p496_p2, %p452_p5  ;;  %p504_p7 = scmp.lt.s32.totalorder %s502_s8, %s495_s25 }
  0x44   : > { %p499_p11 = pneg %p498_p9  ;;  %p505_p3 = por %p504_p7, %p503_p8 }
  0x46   : > { %p506_p6 = pnand %p505_p3, %p499_p11 }
  0x48   : > { %509 = shalt.err (!%p506_p6)
}
  0x49   : > { %392 = dma.hbm_to_vmem [thread:$0]  (!%p700_p0), %s745_s16, 128, %s165_s19, %s153_s30  }
  0x4a   : > { %p854_p13 = scmp.ne.s32.totalorder %s853_s7, 0 }
  0x4b   : > { %s772_s15 = sand.u32 (!%p854_p13), 1, %s580_s10   ;;  %p855_p5 = scmp.ne.s32.totalorder (!%p854_p13), %s847_s21, 0 }
  0x4c   : > { %173 = sbr.rel (%p854_p13) target bundleno = 113 (0x71), region = 28  ;;  %s369_s18 = sshll.u32 (!%p854_p13), %s772_s15, 3 }
  0x4d   : > { %s176_s4 = scalar_lea.sflag (!%p854_p13), [#allocation3], %s772_s15  ;;  %s179_s6 = scalar_lea.vmem (!%p854_p13), [#allocation2], %s369_s18 }
  0x53   : > { %563 = dma.done.wait (%p855_p5), %s176_s4, 128  }
  0x54   : > { %565 = vsyncadd (%p855_p5), %s176_s4, 4294967168  ;;  %s185_s5 = scalar_lea.sflag [#allocation6], %s772_s15  ;;  %s188_s16 = scalar_lea.vmem [#allocation5], %s369_s18 }
  0x55   : > { %567 = dma.done.wait (%p855_p5), %s185_s5, 128  }
  0x56   : > { %569 = vsyncadd (%p855_p5), %s185_s5, 4294967168  ;;  %s378_s7 = smul.u32 24, %s772_s15  ;;  %v223_v0 = vld [vmem:[%s179_s6] sm:$0xff]  ;;  %v224_v1 = vld [vmem:[%s188_s16] sm:$0xff]  ;;  %s241_s21 = scalar_lea.sflag [#allocation4], %s772_s15 }
  0x57   : > { %s379_s19 = smul.u32 384, %s588_s12  ;;  %v226_v2 = vmul.f32 %v224_v1, %v223_v0  ;;  %p856_p0 = scmp.ne.s32.totalorder %s848_s22, 0 }
  0x58   : > { %s213_s30 = scalar_lea.vmem [#allocation7], %s378_s7  ;;  %s600_s25 = smov [#allocation7]  }
  0x59   : > { %s254_s20 = sshll.u32 %s213_s30, 4  ;;  %372 = vst [vmem:[%s213_s30 + $0x8] sm:$0xff] %v223_v0  ;;  %374 = vst [vmem:[%s213_s30 + $0x10] sm:$0xff] %v224_v1  ;;  %s790_s29 = scalar_lea.hbm %s843_s2, %s379_s19  ;;  %s792_s20 = int_to_ptr.vmem [resolvable:$true] %s254_s20 }
  0x5a   : > { %229 = vst [vmem:[%s213_s30] sm:$0xff] %v226_v2  ;;  %s510_s12 = scalar_lea.vmem %s792_s20, 384  ;;  %s514_s26 = sshll.u32 %s600_s25, 4  ;;  %s515_s26 = int_to_ptr.vmem [resolvable:$false] %s514_s26 }
  0x5b   : > { %p511_p8 = scmp.ne.s32.totalorder %s792_s20, %s510_s12  ;;  %s516_s3 = scalar_lea.vmem %s515_s26, 768 }
  0x5c   : > { %p517_p10 = scmp.lt.s32.totalorder %s792_s20, %s515_s26  ;;  %p518_p12 = scmp.lt.s32.totalorder %s516_s3, %s510_s12 }
  0x5d   : > { %p512_p7 = pnand %p511_p8, %p856_p0 }
  0x5e   : > { %p519_p1 = por %p518_p12, %p517_p10 }
  0x5f   : > { %p513_p4 = pneg %p512_p7 }
  0x61   : > { %p520_p2 = pnand %p519_p1, %p513_p4 }
  0x63   : > { %523 = shalt.err (!%p520_p2)
}
  0x64   : > { %s524_s8 = scalar_lea.hbm %s790_s29, 384  ;;  %s528_s6 = scalar_lea.hbm %s843_s2, 768 }
  0x65   : > { %p525_p9 = scmp.ne.s32.totalorder %s790_s29, %s524_s8  ;;  %p529_p6 = scmp.lt.u32.totalorder %s790_s29, %s843_s2 }
  0x66   : > { %p530_p13 = scmp.lt.u32.totalorder %s528_s6, %s524_s8  ;;  %p532_p8 = scmp.lt.u32.totalorder %s524_s8, %s790_s29 }
  0x67   : > { %p526_p11 = pnand %p525_p9, %p856_p0 }
  0x68   : > { %p531_p5 = por %p530_p13, %p529_p6 }
  0x69   : > { %p527_p3 = pneg %p526_p11 }
  0x6a   : > { %p533_p7 = por %p532_p8, %p531_p5 }
  0x6c   : > { %p534_p4 = pnand %p533_p7, %p527_p3 }
  0x6e   : > { %537 = shalt.err (!%p534_p4)
}
  0x6f   : > { %s601_s7 = smov 128   ;;  %s602_s19 = smov 8  }
  0x70   : > { %384 = dma.vmem_to_hbm [thread:$0]  (%p856_p0), %s792_s20, 384, %s790_s29, %s241_s21, %s601_s7, %s601_s7, %s602_s19  }
  0x71 PF: > { %s269_s30 = sand.u32 1, %s576_s9   ;;  %p857_p10 = scmp.ne.s32.totalorder %s849_s24, 0 }
  0x72   : > { %p858_p12 = scmp.ge.s32.totalorder %s596_s14, 2  ;;  %s270_s27 = scalar_lea.sflag [#allocation4], %s269_s30 }
  0x74   : > { %p394_p1 = pnand %p858_p12, %p857_p10 }
  0x76   : > { %571 = dma.done.wait (!%p394_p1), %s270_s27, 384  }
  0x77   : > { %573 = vsyncadd (!%p394_p1), %s270_s27, 4294966912  ;;  %s21_s14 = sadd.s32 1, %s596_s14   ;;  %s859_s9 = smov %s580_s10 }
  0x78   : > { %p18_p2 = scmp.ge.s32.totalorder %s21_s14, 4   ;;  %s860_s10 = smov %s584_s11 }
  0x79   : > { %s861_s11 = smov %s674_s23  ;;  %s862_s12 = smov %s592_s13 }
  0x7a   : > { %s863_s13 = smov %s865_s17  ;;  %20 = sbr.rel (!%p18_p2) target bundleno = 8 (0x8), region = 92 }
  0x81   :  { %275 = vsyncpa [#allocation3], 1 }
  0x82   :  { %277 = vsyncpa [#allocation3 + $0x1], 1 }
  0x83   :  { %278 = vsyncpa [#allocation6], 1 }
  0x84   :  { %280 = vsyncpa [#allocation6 + $0x1], 1 }
  0x85   :  { %281 = vsyncpa [#allocation4], 1 }
  0x86   :  { %283 = vsyncpa [#allocation4 + $0x1], 1 }

</bundles_post_ra>
